<compile_context>
chip_gen: v5e
topology: v5e:2x2
jax: 0.10.0
libtpu: 0.0.40
codegen_flags: <defaults>
</compile_context>

<pallas_src>
import jax
import jax.numpy as jnp
import numpy as np
from jax.experimental import pallas as pl
from jax.experimental.pallas import tpu as pltpu


def build_grid(resolution):
    """JAX port of the numpy grid builder: returns (1, H, W, 4) float32."""
    ranges = [np.linspace(0.0, 1.0, num=res) for res in resolution]
    grid = np.meshgrid(*ranges, sparse=False, indexing="ij")
    grid = np.stack(grid, axis=-1)
    grid = np.reshape(grid, [resolution[0], resolution[1], -1])
    grid = np.expand_dims(grid, axis=0).astype(np.float32)
    grid = np.concatenate([grid, 1.0 - grid], axis=-1)  # (1, H, W, 4)
    return jnp.asarray(grid)


def _add_pos_kernel(pos_ref, x_ref, o_ref):
    # pos_ref: (1, R, lb), x_ref / o_ref: (B, R, lb).
    # Upcast both operands to fp32 in-register, add on the VPU, cast back.
    x = x_ref[...].astype(jnp.float32)
    p = pos_ref[...].astype(jnp.float32)          # broadcasts over batch dim
    o_ref[...] = (x + p).astype(o_ref.dtype)


def _choose_lane_block(L, B, R, x_bytes, pos_bytes, budget_bytes):
    """Largest lane block `lb` (multiple of 128, dividing L) whose
    double-buffered VMEM footprint fits `budget_bytes`.

    Footprint per lane column (padding-aware: R is already a multiple of 8 or
    the full extent, so there is no hidden sublane padding):
        2 buffers * (x block + out block)  +  2 buffers * pos block
    Returns L (single full-extent block / one grid step) for small tensors.
    """
    if L % 128 != 0:
        return L                                  # full-extent fallback (legal)
    per_lane = 2 * (2 * B * R * x_bytes + R * pos_bytes)
    max_lb = budget_bytes // per_lane
    if max_lb >= L:
        return L                                  # tiny tensor: one grid step
    best = 128
    for lb in range(128, L, 128):
        if lb > max_lb:
            break
        if L % lb == 0:
            best = lb
    return best


# Footprint budget for the double-buffered tile data; the explicit scoped-VMEM
# limit below leaves ~2x headroom.  48 MiB is within v7x's 64 MiB physical
# VMEM and well under v5e/v6e's 128 MiB.
_TILE_VMEM_BUDGET = 24 * 1024 * 1024
_VMEM_LIMIT_BYTES = 48 * 1024 * 1024


def soft_position_embed(inputs, grid, weight, bias):
    """inputs: (B, H, W, C); grid: (1, H, W, 4); weight: (4, C); bias: (C,).

    `weight` is the transpose of the PyTorch nn.Linear(4, C) weight (C, 4).
    """
    B, H, W, C = inputs.shape
    N = H * W * C

    # Hoisted, batch-invariant positional embedding (tiny fp32 matmul done by
    # XLA outside the kernel), stored in the input dtype to halve its HBM
    # bytes for bf16 activations (no-op for fp32 inputs).
    pos = jnp.einsum(
        "hwf,fc->hwc",
        grid.reshape(H, W, 4).astype(jnp.float32),
        weight.astype(jnp.float32),
    ) + bias.astype(jnp.float32)
    pos = pos.astype(inputs.dtype)

    # Sublane/lane-dense 3-D view: (B, R, L) with R % 8 == 0, L % 128 == 0
    # whenever possible.  Falls back to a single full-extent row otherwise
    # (legal, just padded/masked — correctness unaffected).
    if N % 1024 == 0:
        R, L = 8, N // 8
    else:
        R, L = 1, N

    x_bytes = inputs.dtype.itemsize
    pos_bytes = pos.dtype.itemsize
    lb = _choose_lane_block(L, B, R, x_bytes, pos_bytes, _TILE_VMEM_BUDGET)
    n_lane_tiles = L // lb

    x_3d = inputs.reshape(B, R, L)
    pos_3d = pos.reshape(1, R, L)

    cost = pl.CostEstimate(
        flops=B * N,
        transcendentals=0,
        bytes_accessed=2 * B * N * x_bytes + N * pos_bytes,
    )

    out = pl.pallas_call(
        _add_pos_kernel,
        out_shape=jax.ShapeDtypeStruct((B, R, L), inputs.dtype),
        grid_spec=pltpu.PrefetchScalarGridSpec(
            num_scalar_prefetch=0,
            grid=(n_lane_tiles,),
            in_specs=[
                pl.BlockSpec((1, R, lb), lambda j: (0, 0, j)),  # shared pos
                pl.BlockSpec((B, R, lb), lambda j: (0, 0, j)),  # inputs tile
            ],
            out_specs=pl.BlockSpec((B, R, lb), lambda j: (0, 0, j)),
        ),
        compiler_params=pltpu.CompilerParams(
            dimension_semantics=("parallel",),
            vmem_limit_bytes=_VMEM_LIMIT_BYTES,
        ),
        cost_estimate=cost,
    )(pos_3d, x_3d)
    return out.reshape(B, H, W, C)


if __name__ == "__main__":
    B, H, W, C = 2, 16, 16, 32
    key = jax.random.PRNGKey(0)
    k_x, k_w, k_b = jax.random.split(key, 3)

    inputs = jax.random.normal(k_x, (B, H, W, C), dtype=jnp.float32)
    # nn.Linear(4, hidden) parameters: weight (hidden, 4), bias (hidden,).
    # We store weight transposed as (4, hidden) for the embedding matmul.
    weight = jax.random.normal(k_w, (4, C), dtype=jnp.float32) * 0.5
    bias = jax.random.normal(k_b, (C,), dtype=jnp.float32) * 0.1
    grid = build_grid((H, W))

    out = soft_position_embed(inputs, grid, weight, bias)
    out = jax.block_until_ready(out)

    # Reference check in plain JAX (mirrors the PyTorch forward).
    ref = inputs + (jnp.einsum("ohwf,fc->ohwc", grid, weight) + bias)
    assert out.shape == (B, H, W, C)
    np.testing.assert_allclose(np.asarray(out), np.asarray(ref),
                               rtol=1e-5, atol=1e-5)
    print("KERNEL_OK")
</pallas_src>

<mosaic_0001>
module attributes {stable_mosaic.version = 11 : i64} {
  func.func @_add_pos_kernel(%arg0: i32, %arg1: memref<1x8x1024xf32, #tpu.memory_space<vmem>>, %arg2: memref<2x8x1024xf32, #tpu.memory_space<vmem>>, %arg3: memref<2x8x1024xf32, #tpu.memory_space<vmem>>) attributes {dimension_semantics = [#tpu.dimension_semantics<parallel>], iteration_bounds = array<i64: 1>, scalar_prefetch = 0 : i64, scratch_operands = 0 : i64, tpu.core_type = #tpu.core_type<tc>, window_params = [{transform_indices = @transform_0, window_bounds = array<i64: 1, 8, 1024>}, {transform_indices = @transform_1, window_bounds = array<i64: 2, 8, 1024>}, {transform_indices = @transform_2, window_bounds = array<i64: 2, 8, 1024>}]} {
    %c0 = arith.constant 0 : index
    %c0_0 = arith.constant 0 : index
    %c0_1 = arith.constant 0 : index
    %0 = vector.load %arg2[%c0, %c0_0, %c0_1] : memref<2x8x1024xf32, #tpu.memory_space<vmem>>, vector<2x8x1024xf32>
    %c0_2 = arith.constant 0 : index
    %c0_3 = arith.constant 0 : index
    %c0_4 = arith.constant 0 : index
    %1 = vector.load %arg1[%c0_2, %c0_3, %c0_4] : memref<1x8x1024xf32, #tpu.memory_space<vmem>>, vector<1x8x1024xf32>
    %2 = vector.broadcast %1 : vector<1x8x1024xf32> to vector<2x8x1024xf32>
    %3 = arith.addf %0, %2 : vector<2x8x1024xf32>
    %c0_5 = arith.constant 0 : index
    %c0_6 = arith.constant 0 : index
    %c0_7 = arith.constant 0 : index
    %4 = vector.load %arg3[%c0_5, %c0_6, %c0_7] : memref<2x8x1024xf32, #tpu.memory_space<vmem>>, vector<2x8x1024xf32>
    tpu.vector_store %arg3[%c0_5, %c0_6, %c0_7], %3 {strides = array<i32>} : memref<2x8x1024xf32, #tpu.memory_space<vmem>>, vector<2x8x1024xf32>,
    return
  }
  func.func @transform_0(%arg0: i32) -> (i32, i32, i32) {
    %c0_i32 = arith.constant 0 : i32
    %c0_i32_0 = arith.constant 0 : i32
    %c0_i32_1 = arith.constant 0 : i32
    return %c0_i32, %c0_i32_0, %arg0 : i32, i32, i32
  }
  func.func @transform_1(%arg0: i32) -> (i32, i32, i32) {
    %c0_i32 = arith.constant 0 : i32
    %c0_i32_0 = arith.constant 0 : i32
    %c0_i32_1 = arith.constant 0 : i32
    return %c0_i32, %c0_i32_0, %arg0 : i32, i32, i32
  }
  func.func @transform_2(%arg0: i32) -> (i32, i32, i32) {
    %c0_i32 = arith.constant 0 : i32
    %c0_i32_0 = arith.constant 0 : i32
    %c0_i32_1 = arith.constant 0 : i32
    return %c0_i32, %c0_i32_0, %arg0 : i32, i32, i32
  }
}

</mosaic_0001>

<bundles_post_ra>
// kernel: tpu_custom_call.1
= control target key start
LH: loop header
LB: loop body
LE: loop exit
PB: predicated region body
PF: predicated region fallthrough
CT: control target
= control target key end

     0   :  { %7 = vsyncpa [#allocation3], 0  ;;  %s236_s0 = inlined_call_operand.hbm [shape: f32[1,8,1024], index: 0, kind: input, shape index: {}]   ;;  %s237_s1 = inlined_call_operand.hbm [shape: f32[2,8,1024], index: 1, kind: input, shape index: {}]   ;;  %s238_s2 = inlined_call_operand.hbm [shape: f32[2,8,1024], index: 2, kind: output, shape index: {}]  }
   0x1   :  { %8 = vsyncpa [#allocation6], 0 }
   0x2   :  { %9 = vsyncpa [#allocation4], 0  ;;  %s15_s11 = sshll.u32 %s236_s0, 4  ;;  %s201_s12 = smov [#allocation2]   ;;  %s16_s11 = int_to_ptr.hbm [resolvable:$true] %s15_s11 }
   0x3   :  { %s17_s13 = sshll.u32 %s201_s12, 4  ;;  %s25_s16 = sshll.u32 %s237_s1, 4  ;;  %s18_s13 = int_to_ptr.vmem [resolvable:$true] %s17_s13  ;;  %s26_s16 = int_to_ptr.hbm [resolvable:$true] %s25_s16 }
   0x4   :  { %20 = dma.hbm_to_vmem [thread:$0]  %s16_s11, 1024, %s18_s13, [#allocation3]  }
   0x5   :  { %s202_s17 = smov [#allocation5]   ;;  %s203_s19 = smov 1024  }
   0x6   :  { %s27_s18 = sshll.u32 %s202_s17, 4  ;;  %s204_s20 = smov 64   ;;  %s28_s18 = int_to_ptr.vmem [resolvable:$true] %s27_s18 }
   0x7   :  { %33 = dma.hbm_to_vmem [thread:$0]  %s26_s16, 2048, %s28_s18, [#allocation6], %s203_s19, %s203_s19, %s204_s20  }
   0x8   :  { %195 = dma.done.wait [#allocation3], 1024  }
   0x9   :  { %196 = vsyncadd [#allocation3], 4294966272 }
   0xa   :  { %197 = dma.done.wait [#allocation6], 2048  }
   0xb   :  { %198 = vsyncadd [#allocation6], 4294965248  ;;  %v42_v0 = vld [vmem:[#allocation5] sm:$0xff]  ;;  %v43_v2 = vld [vmem:[#allocation5 + $0x8] sm:$0xff]  ;;  %s205_s0 = smov [#allocation7]   ;;  %s104_s23 = sshll.u32 %s238_s2, 4  ;;  %s105_s23 = int_to_ptr.hbm [resolvable:$true] %s104_s23 }
   0xc   :  { %v58_v1 = vld [vmem:[#allocation2] sm:$0xff]  ;;  %v59_v4 = vld [vmem:[#allocation2 + $0x8] sm:$0xff]  ;;  %v44_v5 = vld [vmem:[#allocation5 + $0x10] sm:$0xff]  ;;  %s102_s1 = sshll.u32 %s205_s0, 4  ;;  %s103_s1 = int_to_ptr.vmem [resolvable:$true] %s102_s1 }
   0xd   :  { %v66_v3 = vadd.f32 %v58_v1, %v42_v0  ;;  %v60_v6 = vld [vmem:[#allocation2 + $0x10] sm:$0xff]  ;;  %v67_v7 = vadd.f32 %v59_v4, %v43_v2  ;;  %v45_v9 = vld [vmem:[#allocation5 + $0x18] sm:$0xff]  ;;  %v46_v11 = vld [vmem:[#allocation5 + $0x20] sm:$0xff] }
   0xe   :  { %v68_v8 = vadd.f32 %v60_v6, %v44_v5  ;;  %v61_v10 = vld [vmem:[#allocation2 + $0x18] sm:$0xff]  ;;  %v62_v13 = vld [vmem:[#allocation2 + $0x20] sm:$0xff]  ;;  %v47_v14 = vld [vmem:[#allocation5 + $0x28] sm:$0xff] }
   0xf   :  { %82 = vst [vmem:[#allocation7] sm:$0xff] %v66_v3  ;;  %v69_v12 = vadd.f32 %v61_v10, %v45_v9  ;;  %v63_v15 = vld [vmem:[#allocation2 + $0x28] sm:$0xff]  ;;  %v70_v16 = vadd.f32 %v62_v13, %v46_v11  ;;  %v48_v18 = vld [vmem:[#allocation5 + $0x30] sm:$0xff]  ;;  %v49_v20 = vld [vmem:[#allocation5 + $0x38] sm:$0xff] }
  0x10   :  { %83 = vst [vmem:[#allocation7 + $0x8] sm:$0xff] %v67_v7  ;;  %v71_v17 = vadd.f32 %v63_v15, %v47_v14  ;;  %v64_v19 = vld [vmem:[#allocation2 + $0x30] sm:$0xff]  ;;  %v65_v22 = vld [vmem:[#allocation2 + $0x38] sm:$0xff]  ;;  %v50_v23 = vld [vmem:[#allocation5 + $0x40] sm:$0xff] }
  0x11   :  { %84 = vst [vmem:[#allocation7 + $0x10] sm:$0xff] %v68_v8  ;;  %v72_v21 = vadd.f32 %v64_v19, %v48_v18  ;;  %v51_v24 = vld [vmem:[#allocation5 + $0x48] sm:$0xff]  ;;  %v73_v25 = vadd.f32 %v65_v22, %v49_v20  ;;  %v52_v26 = vld [vmem:[#allocation5 + $0x50] sm:$0xff]  ;;  %v74_v27 = vadd.f32 %v58_v1, %v50_v23  ;;  %v53_v28 = vld [vmem:[#allocation5 + $0x58] sm:$0xff] }
  0x12   :  { %85 = vst [vmem:[#allocation7 + $0x18] sm:$0xff] %v69_v12  ;;  %v75_v29 = vadd.f32 %v59_v4, %v51_v24  ;;  %v54_v30 = vld [vmem:[#allocation5 + $0x60] sm:$0xff]  ;;  %v76_v31 = vadd.f32 %v60_v6, %v52_v26  ;;  %v55_v32 = vld [vmem:[#allocation5 + $0x68] sm:$0xff]  ;;  %v77_v33 = vadd.f32 %v61_v10, %v53_v28  ;;  %v56_v34 = vld [vmem:[#allocation5 + $0x70] sm:$0xff] }
  0x13   :  { %86 = vst [vmem:[#allocation7 + $0x20] sm:$0xff] %v70_v16  ;;  %v78_v35 = vadd.f32 %v62_v13, %v54_v30  ;;  %v57_v36 = vld [vmem:[#allocation5 + $0x78] sm:$0xff]  ;;  %v79_v37 = vadd.f32 %v63_v15, %v55_v32  ;;  %v80_v38 = vadd.f32 %v64_v19, %v56_v34 }
  0x14   :  { %87 = vst [vmem:[#allocation7 + $0x28] sm:$0xff] %v71_v17  ;;  %v81_v39 = vadd.f32 %v65_v22, %v57_v36 }
  0x15   :  { %88 = vst [vmem:[#allocation7 + $0x30] sm:$0xff] %v72_v21 }
  0x16   :  { %89 = vst [vmem:[#allocation7 + $0x38] sm:$0xff] %v73_v25 }
  0x17   :  { %90 = vst [vmem:[#allocation7 + $0x40] sm:$0xff] %v74_v27 }
  0x18   :  { %91 = vst [vmem:[#allocation7 + $0x48] sm:$0xff] %v75_v29 }
  0x19   :  { %92 = vst [vmem:[#allocation7 + $0x50] sm:$0xff] %v76_v31 }
  0x1a   :  { %93 = vst [vmem:[#allocation7 + $0x58] sm:$0xff] %v77_v33 }
  0x1b   :  { %94 = vst [vmem:[#allocation7 + $0x60] sm:$0xff] %v78_v35 }
  0x1c   :  { %95 = vst [vmem:[#allocation7 + $0x68] sm:$0xff] %v79_v37 }
  0x1d   :  { %96 = vst [vmem:[#allocation7 + $0x70] sm:$0xff] %v80_v38 }
  0x1e   :  { %97 = vst [vmem:[#allocation7 + $0x78] sm:$0xff] %v81_v39 }
  0x1f   :  { %110 = dma.vmem_to_hbm [thread:$0]  %s103_s1, 2048, %s105_s23, [#allocation4], %s203_s19, %s203_s19, %s204_s20  }
  0x20   :  { %199 = dma.done.wait [#allocation4], 2048  }
  0x21   :  { %200 = vsyncadd [#allocation4], 4294965248 }
  0x22   :  { %115 = vsyncpa [#allocation3], 1 }
  0x23   :  { %116 = vsyncpa [#allocation6], 1 }
  0x24   :  { %117 = vsyncpa [#allocation4], 1 }

</bundles_post_ra>
